<compile_context>
chip_gen: v7x
topology: tpu7x:2x2x1
jax: 0.10.0
libtpu: 0.0.40
codegen_flags: <defaults>
</compile_context>

<pallas_src>
import jax
import jax.numpy as jnp
from jax.experimental import pallas as pl
from jax.experimental.pallas import tpu as pltpu

_MIB = 1024 * 1024


def linear_kernel(wb_ref, x_ref, o_ref):
    # wb_ref: (2,) f32 in SMEM (scalar prefetch): [w, b]
    # x_ref / o_ref: (rows_per_tile, lane_width) tiles in VMEM
    w = wb_ref[0]
    b = wb_ref[1]
    # VPU fma; keep off the MXU (K=1 contraction would waste it).
    o_ref[...] = (x_ref[...] * w + b).astype(o_ref.dtype)


def _pick_tile_config():
    """Generation-aware (rows_per_tile, vmem_limit_bytes) for 1024-lane f32 tiles."""
    try:
        vmem = pltpu.get_tpu_info().vmem_capacity_bytes
    except Exception:
        return 512, None                 # 2 MiB tiles fit every default scoped limit
    if vmem >= 128 * _MIB:               # v5e / v6e: 128 MiB physical VMEM
        return 1024, 64 * _MIB           # 4 MiB tiles -> 16 MiB dbl-buffered in+out
    if vmem >= 64 * _MIB:                # v7x: 64 MiB per TensorCore
        return 2048, 48 * _MIB           # 8 MiB tiles -> 32 MiB working set
    return 512, None                     # unknown / small chip: stay conservative


def _effective_rows_per_tile(rows, rows_per_tile):
    """Clamp the tile so the grid has >=2 steps when possible (v7x megacore)."""
    if rows > rows_per_tile:
        return rows_per_tile
    if rows <= 8:
        return rows                      # full-extent block (allowed below (8,128))
    half = -(-rows // 2)                 # ceil(rows / 2)
    return min(rows, -(-half // 8) * 8)  # round up to a sublane multiple


def simple_model_forward(
    x,
    weight,
    bias,
    *,
    lane_width=1024,          # lane-dense slab width (multiple of 128)
    rows_per_tile=None,       # None -> pick per generation
    vmem_limit_bytes=None,    # None -> pick per generation (when rows_per_tile is None)
    min_kernel_elems=None,    # below this, use plain-JAX fma
):
    """x: (N, 1), weight: (1, 1), bias: (1,) -> (N, 1)."""
    n, f = x.shape
    assert f == 1 and weight.shape == (1, 1) and bias.shape == (1,)

    # Keep parameters in f32 (PyTorch Linear semantics), cast only the output.
    w = weight.reshape(()).astype(jnp.float32)
    b = bias.reshape(()).astype(jnp.float32)

    if rows_per_tile is None:
        rows_per_tile, auto_vmem = _pick_tile_config()
        if vmem_limit_bytes is None:
            vmem_limit_bytes = auto_vmem

    if min_kernel_elems is None:
        min_kernel_elems = 8 * lane_width

    # Tiny batch: pallas_call / custom-call overhead dwarfs the fma.
    if n < min_kernel_elems:
        return (x.astype(jnp.float32) * w + b).astype(x.dtype)

    # Lane-dense view.  Pad only up to a multiple of lane_width (<= 1023 dead
    # elements); skip the pad (and the later slice-back) when already aligned.
    flat = x.reshape(n)
    padded_n = pl.cdiv(n, lane_width) * lane_width
    padded = padded_n != n
    if padded:
        flat = jnp.pad(flat, (0, padded_n - n))
    rows = padded_n // lane_width
    x2d = flat.reshape(rows, lane_width)

    rpt = _effective_rows_per_tile(rows, rows_per_tile)
    grid = (pl.cdiv(rows, rpt),)         # partial last block is masked by Pallas
    block = (rpt, lane_width)

    wb = jnp.stack([w, b])               # (2,) f32 -> SMEM via scalar prefetch

    compiler_kwargs = dict(dimension_semantics=("parallel",))
    if vmem_limit_bytes is not None:
        compiler_kwargs["vmem_limit_bytes"] = vmem_limit_bytes

    out2d = pl.pallas_call(
        linear_kernel,
        out_shape=jax.ShapeDtypeStruct((rows, lane_width), x.dtype),
        grid_spec=pltpu.PrefetchScalarGridSpec(
            num_scalar_prefetch=1,
            grid=grid,
            in_specs=[pl.BlockSpec(block, lambda i, wb: (i, 0))],
            out_specs=pl.BlockSpec(block, lambda i, wb: (i, 0)),
        ),
        compiler_params=pltpu.CompilerParams(**compiler_kwargs),
        cost_estimate=pl.CostEstimate(
            flops=2 * padded_n,
            transcendentals=0,
            bytes_accessed=2 * x.dtype.itemsize * padded_n,  # read + write
        ),
        # Reuse the freshly-padded temporary as the output buffer; don't alias
        # the unpadded path (x2d is then just a view of the caller's array).
        input_output_aliases={1: 0} if padded else {},
    )(wb, x2d)

    if padded:
        return out2d.reshape(padded_n)[:n].reshape(n, 1)
    return out2d.reshape(n, 1)


if __name__ == "__main__":
    key = jax.random.PRNGKey(0)
    kx, kw, kb = jax.random.split(key, 3)

    # Deterministic parameter init (shapes from nn.Linear(1, 1)).
    weight = jax.random.uniform(kw, (1, 1), jnp.float32, minval=-1.0, maxval=1.0)
    bias = jax.random.uniform(kb, (1,), jnp.float32, minval=-1.0, maxval=1.0)

    # 1) Module-scale tiny batch (N=8): plain-JAX fma fallback path.
    x_small = jax.random.normal(kx, (8, 1), jnp.float32)
    y_small = jax.block_until_ready(simple_model_forward(x_small, weight, bias))
    assert y_small.shape == (8, 1)
    assert jnp.allclose(y_small, x_small @ weight.T + bias, atol=1e-6), \
        "mismatch vs reference (tiny-batch path)"

    # 2) Kernel path, lane-aligned N: no pad, no slice-back, 2 grid steps.
    n_aligned = 16 * 256
    x_a = jax.random.normal(kx, (n_aligned, 1), jnp.float32)
    y_a = jax.block_until_ready(
        simple_model_forward(
            x_a, weight, bias, lane_width=256, rows_per_tile=8, min_kernel_elems=1
        )
    )
    assert y_a.shape == (n_aligned, 1)
    assert jnp.allclose(y_a, x_a @ weight.T + bias, atol=1e-6), \
        "mismatch vs reference (aligned kernel path)"

    # 3) Kernel path, ragged N: pad only to a lane multiple, masked last block,
    #    padded temporary aliased to the output.
    n_ragged = 10257
    x_r = jax.random.normal(kx, (n_ragged, 1), jnp.float32)
    y_r = jax.block_until_ready(
        simple_model_forward(
            x_r, weight, bias, lane_width=256, rows_per_tile=8, min_kernel_elems=1
        )
    )
    assert y_r.shape == (n_ragged, 1)
    assert jnp.allclose(y_r, x_r @ weight.T + bias, atol=1e-6), \
        "mismatch vs reference (ragged kernel path)"

    # 4) Default (generation-auto-tiled) config on a moderately large batch.
    n_big = 300_000
    x_b = jax.random.normal(kx, (n_big, 1), jnp.float32)
    y_b = jax.block_until_ready(simple_model_forward(x_b, weight, bias))
    assert y_b.shape == (n_big, 1)
    assert jnp.allclose(y_b, x_b @ weight.T + bias, atol=1e-6), \
        "mismatch vs reference (auto-tiled path)"

    print("KERNEL_OK")
</pallas_src>

<mosaic_0001>
module attributes {stable_mosaic.version = 11 : i64} {
  func.func @linear_kernel(%arg0: i32, %arg1: memref<2xf32, #tpu.memory_space<smem>>, %arg2: memref<8x256xf32, #tpu.memory_space<vmem>>, %arg3: memref<8x256xf32, #tpu.memory_space<vmem>>) attributes {dimension_semantics = [#tpu.dimension_semantics<parallel>], iteration_bounds = array<i64: 2>, scalar_prefetch = 1 : i64, scratch_operands = 0 : i64, tpu.core_type = #tpu.core_type<tc>, window_params = [{transform_indices = @transform_0, window_bounds = array<i64: 8, 256>}, {transform_indices = @transform_1, window_bounds = array<i64: 8, 256>}]} {
    %c0 = arith.constant 0 : index
    %0 = memref.load %arg1[%c0] : memref<2xf32, #tpu.memory_space<smem>>
    %c1 = arith.constant 1 : index
    %1 = memref.load %arg1[%c1] : memref<2xf32, #tpu.memory_space<smem>>
    %c0_0 = arith.constant 0 : index
    %c0_1 = arith.constant 0 : index
    %2 = vector.load %arg2[%c0_0, %c0_1] : memref<8x256xf32, #tpu.memory_space<vmem>>, vector<8x256xf32>
    %3 = vector.broadcast %0 : f32 to vector<8x256xf32>
    %4 = arith.mulf %2, %3 : vector<8x256xf32>
    %5 = vector.broadcast %1 : f32 to vector<8x256xf32>
    %6 = arith.addf %4, %5 : vector<8x256xf32>
    %c0_2 = arith.constant 0 : index
    %c0_3 = arith.constant 0 : index
    %7 = vector.load %arg3[%c0_2, %c0_3] : memref<8x256xf32, #tpu.memory_space<vmem>>, vector<8x256xf32>
    tpu.vector_store %arg3[%c0_2, %c0_3], %6 {strides = array<i32>} : memref<8x256xf32, #tpu.memory_space<vmem>>, vector<8x256xf32>,
    return
  }
  func.func @transform_0(%arg0: i32, %arg1: memref<2xf32, #tpu.memory_space<smem>>) -> (i32, i32) {
    %c0_i32 = arith.constant 0 : i32
    %c0_i32_0 = arith.constant 0 : i32
    return %arg0, %c0_i32 : i32, i32
  }
  func.func @transform_1(%arg0: i32, %arg1: memref<2xf32, #tpu.memory_space<smem>>) -> (i32, i32) {
    %c0_i32 = arith.constant 0 : i32
    %c0_i32_0 = arith.constant 0 : i32
    return %arg0, %c0_i32 : i32, i32
  }
}

</mosaic_0001>

<bundles_post_ra>
// kernel: tpu_custom_call.1
= control target key start
LH: loop header
LB: loop body
LE: loop exit
PB: predicated region body
PF: predicated region fallthrough
CT: control target
= control target key end

     0   :  { %s600_s0 = inlined_call_operand.hbm [shape: f32[2], index: 0, kind: input, shape index: {}]   ;;  %s601_s1 = inlined_call_operand.hbm [shape: f32[16,256], index: 1, kind: input, shape index: {}]   ;;  %s602_s2 = inlined_call_operand.hbm [shape: f32[16,256], index: 2, kind: output, shape index: {}]  }
   0x1   :  { %s299_s11 = scalar_lea.hbm %s600_s0, 16 }
   0x2   :  { %p300_p0 = scmp.ne.s32.totalorder %s600_s0, %s299_s11  ;;  %p303_p1 = scmp.lt.u32.totalorder %s299_s11, %s600_s0 }
   0x4   :  { %p305_p2 = pnand %p303_p1, %p300_p0 }
   0x6   :  { %308 = shalt.err (!%p305_p2)  }
   0x7   :  { %s409_s16 = smov [#allocation3]  }
   0x8   :  { %8 = dma.hbm_to_smem %s600_s0, 16, %s409_s16, [#allocation2] }
   0x9   :  { %383 = dma.done.wait [#allocation2], 16 }
   0xa   :  { %384 = vsyncadd [#allocation2], 4294967280 }
   0xb   :  { %10 = sfence }
   0xc   :  { %11 = vsyncpa [#allocation5], 0 }
   0xd   :  { %13 = vsyncpa [#allocation5 + $0x1], 0 }
   0xe   :  { %14 = vsyncpa [#allocation6], 0 }
   0xf   :  { %16 = vsyncpa [#allocation6 + $0x1], 0  ;;  %s439_s19 = smov 0   ;;  %s441_s20 = smov 0  }
  0x10   :  { %s443_s21 = smov 0   ;;  %s445_s22 = smov 0  }
  0x11 LB: > { %s460_s0 = sadd.s32 4294967295, %s407_s22   ;;  %s235_s23 = sadd.s32 4294967294, %s407_s22   ;;  %s407_s22 = sphi %s445_s22, %s617_s22   ;;  %s403_s21 = sphi %s443_s21, %s616_s21   ;;  %s399_s20 = sphi %s441_s20, %s615_s20   ;;  %s395_s19 = sphi %s439_s19, %s614_s19  }
  0x12   : > { %s464_s24 = sadd.s32 1, %s407_s22   ;;  %s29_s25 = sadd.s32 1, %s403_s21 }
  0x13   : > { %s26_s26 = ssub.s32 %s407_s22, %s464_s24  ;;  %p36_p3 = scmp.ne.s32.totalorder %s403_s21, %s399_s20 }
  0x14   : > { %p27_p4 = scmp.eq.s32.totalorder %s26_s26, 0  ;;  %p37_p5 = scmp.eq.s32.totalorder %s407_s22, 0 }
  0x15   : > { %p42_p6 = scmp.ne.s32.totalorder %s399_s20, %s395_s19  ;;  %p43_p7 = scmp.eq.s32.totalorder %s460_s0, 0 }
  0x16   : > { %s476_s27 = scalar_select %p27_p4, %s403_s21, %s29_s25  }
  0x17   : > { %p478_p8 = por %p37_p5, %p36_p3  ;;  %p482_p9 = por %p43_p7, %p42_p6 }
  0x18   : > { %p66_p10 = scmp.eq.s32.totalorder %s460_s0, 1  ;;  %p72_p11 = scmp.eq.s32.totalorder %s235_s23, 1 }
  0x19   : > { %p264_p13 = scmp.lt.s32.totalorder %s407_s22, 2  ;;  %s92_s4 = sand.u32 1, %s403_s21  }
  0x1a   : > { %p489_p0 = por %p66_p10, %p36_p3  ;;  %p493_p1 = por %p72_p11, %p42_p6 }
  0x1b   : > { %s250_s5 = sshll.u32 %s407_s22, 8  ;;  %s238_s6 = sshll.u32 %s92_s4, 4 }
  0x1c   : > { %s606_s30 = scalar_select %p489_p0, 1, 0 }
  0x1d   : > { %s607_s3 = scalar_select %p493_p1, 1, 0 }
  0x1e   : > { %s502_s9 = scalar_lea.hbm %s601_s1, %s250_s5  ;;  %s96_s10 = scalar_lea.vmem [#allocation4], %s238_s6 }
  0x1f   : > { %s104_s11 = sshll.u32 %s96_s10, 4  ;;  %p506_p2 = pnand %p264_p13, %p478_p8  ;;  %s510_s11 = int_to_ptr.vmem [resolvable:$true] %s104_s11 }
  0x20   : > { %s93_s13 = scalar_lea.sflag [#allocation5], %s92_s4  ;;  %s309_s14 = scalar_lea.hbm %s502_s9, 256 }
  0x21   : > { %p310_p5 = scmp.ne.s32.totalorder %s502_s9, %s309_s14  ;;  %p311_p6 = pneg %p506_p2 }
  0x22   : > { %s314_s17 = scalar_lea.hbm %s601_s1, 512  ;;  %p315_p8 = scmp.lt.u32.totalorder %s502_s9, %s601_s1 }
  0x23   : > { %p312_p7 = pnand %p311_p6, %p310_p5  ;;  %p316_p11 = scmp.lt.u32.totalorder %s314_s17, %s309_s14 }
  0x24   : > { %p318_p12 = scmp.lt.u32.totalorder %s309_s14, %s502_s9 }
  0x25   : > { %p313_p10 = pneg %p312_p7  ;;  %p317_p13 = por %p316_p11, %p315_p8 }
  0x27   : > { %p319_p3 = por %p318_p12, %p317_p13 }
  0x29   : > { %p320_p4 = pnand %p319_p3, %p313_p10 }
  0x2b   : > { %323 = shalt.err (!%p320_p4)
}
  0x2c   : > { %s324_s25 = scalar_lea.vmem %s510_s11, 256  ;;  %s410_s26 = smov [#allocation4]  }
  0x2d   : > { %p325_p5 = scmp.ne.s32.totalorder %s510_s11, %s324_s25  ;;  %s329_s28 = sshll.u32 %s410_s26, 4  ;;  %s330_s28 = int_to_ptr.vmem [resolvable:$false] %s329_s28 }
  0x2e   : > { %s331_s4 = scalar_lea.vmem %s330_s28, 512  ;;  %p332_p0 = scmp.lt.s32.totalorder %s510_s11, %s330_s28 }
  0x2f   : > { %p327_p7 = pnand %p325_p5, %p311_p6  ;;  %p333_p8 = scmp.lt.s32.totalorder %s331_s4, %s324_s25 }
  0x31   : > { %p328_p1 = pneg %p327_p7  ;;  %p334_p11 = por %p333_p8, %p332_p0 }
  0x33   : > { %p335_p12 = pnand %p334_p11, %p328_p1 }
  0x35   : > { %338 = shalt.err (!%p335_p12)
}
  0x36   : > { %259 = dma.hbm_to_vmem [thread:$0]  (!%p506_p2), %s502_s9, 256, %s510_s11, %s93_s13  }
  0x37   : > { %p609_p3 = scmp.lt.s32.totalorder %s407_s22, 3  ;;  %p610_p4 = scmp.ge.s32.totalorder %s407_s22, 1 }
  0x39   : > { %p110_p6 = pnand %p610_p4, %p609_p3 }
  0x3a   : > { %s544_s5 = sand.u32 (!%p110_p6), 1, %s399_s20  }
  0x3b   : > { %113 = sbr.rel (%p110_p6) target bundleno = 94 (0x5e), region = 24  ;;  %s242_s6 = sshll.u32 (!%p110_p6), %s544_s5, 4 }
  0x3c   : > { %s116_s7 = scalar_lea.sflag (!%p110_p6), [#allocation5], %s544_s5  ;;  %s119_s8 = scalar_lea.vmem (!%p110_p6), [#allocation4], %s242_s6 }
  0x42   : > { %386 = dma.done.wait (%p482_p9), %s116_s7, 256  }
  0x43   : > { %388 = vsyncadd (%p482_p9), %s116_s7, 4294967040  ;;  %s138_s9 = sld [smem:[#allocation3]]  ;;  %s244_s10 = sld [smem:[#allocation3 + $0x1]]  ;;  %v140_v0 = vld [vmem:[%s119_s8] sm:$0xff]  ;;  %v141_v3 = vld [vmem:[%s119_s8 + $0x8] sm:$0xff] }
  0x44   : > { %s137_s11 = scalar_lea.vmem [#allocation7], %s242_s6  ;;  %s251_s13 = sshll.u32 %s460_s0, 8 }
  0x45   : > { %s165_s12 = sshll.u32 %s137_s11, 4  ;;  %s558_s15 = scalar_lea.hbm %s602_s2, %s251_s13  ;;  %s553_s12 = int_to_ptr.vmem [resolvable:$true] %s165_s12 }
  0x46   : > { %s151_s16 = scalar_lea.sflag [#allocation6], %s544_s5  ;;  %s339_s17 = scalar_lea.vmem %s553_s12, 256 }
  0x47   : > { %p340_p9 = scmp.ne.s32.totalorder %s553_s12, %s339_s17  ;;  %p611_p0 = scmp.ne.s32.totalorder %s606_s30, 0 }
  0x48   : > { %s411_s0 = smov [#allocation7]  }
  0x49   : > { %v142_v1 = vstv %s138_s9  ;;  %v145_v2 = vstv %s244_s10  ;;  %p341_p1 = pnand %p340_p9, %p611_p0  ;;  %s343_s18 = sshll.u32 %s411_s0, 4  ;;  %s344_s18 = int_to_ptr.vmem [resolvable:$false] %s343_s18 }
  0x4a   : > { %v143_v4 = vmul.f32 %v142_v1, %v140_v0  ;;  %v144_v5 = vmul.f32 %v142_v1, %v141_v3  ;;  %s345_s23 = scalar_lea.vmem %s344_s18, 512  ;;  %p346_p10 = scmp.lt.s32.totalorder %s553_s12, %s344_s18 }
  0x4b   : > { %p342_p2 = pneg %p341_p1  ;;  %p347_p13 = scmp.lt.s32.totalorder %s345_s23, %s339_s17 }
  0x4c   : > { %v146_v6 = vadd.f32 %v145_v2, %v143_v4  ;;  %v147_v7 = vadd.f32 %v145_v2, %v144_v5 }
  0x4d   : > { %p348_p5 = por %p347_p13, %p346_p10 }
  0x4e   : > { %148 = vst [vmem:[%s137_s11] sm:$0xff] %v146_v6  ;;  %149 = vst [vmem:[%s137_s11 + $0x8] sm:$0xff] %v147_v7 }
  0x4f   : > { %p349_p7 = pnand %p348_p5, %p342_p2 }
  0x51   : > { %352 = shalt.err (!%p349_p7)
}
  0x52   : > { %s353_s25 = scalar_lea.hbm %s558_s15, 256  ;;  %s357_s4 = scalar_lea.hbm %s602_s2, 512 }
  0x53   : > { %p354_p8 = scmp.ne.s32.totalorder %s558_s15, %s353_s25  ;;  %p358_p3 = scmp.lt.u32.totalorder %s558_s15, %s602_s2 }
  0x54   : > { %p359_p4 = scmp.lt.u32.totalorder %s357_s4, %s353_s25  ;;  %p361_p9 = scmp.lt.u32.totalorder %s353_s25, %s558_s15 }
  0x55   : > { %p355_p11 = pnand %p354_p8, %p611_p0 }
  0x56   : > { %p360_p6 = por %p359_p4, %p358_p3 }
  0x57   : > { %p356_p12 = pneg %p355_p11 }
  0x58   : > { %p362_p1 = por %p361_p9, %p360_p6 }
  0x5a   : > { %p363_p2 = pnand %p362_p1, %p356_p12 }
  0x5c   : > { %366 = shalt.err (!%p363_p2)
}
  0x5d   : > { %254 = dma.vmem_to_hbm [thread:$0]  (%p611_p0), %s553_s12, 256, %s558_s15, %s151_s16  }
  0x5e PF: > { %s177_s7 = sand.u32 1, %s395_s19   ;;  %p612_p10 = scmp.ne.s32.totalorder %s607_s3, 0 }
  0x5f   : > { %p613_p13 = scmp.ge.s32.totalorder %s407_s22, 2  ;;  %s178_s8 = scalar_lea.sflag [#allocation6], %s177_s7 }
  0x61   : > { %p261_p5 = pnand %p613_p13, %p612_p10 }
  0x63   : > { %390 = dma.done.wait (!%p261_p5), %s178_s8, 256  }
  0x64   : > { %392 = vsyncadd (!%p261_p5), %s178_s8, 4294967040  ;;  %p19_p7 = scmp.ge.s32.totalorder %s464_s24, 4   ;;  %s614_s19 = smov %s399_s20 }
  0x65   : > { %s615_s20 = smov %s403_s21  ;;  %s616_s21 = smov %s476_s27 }
  0x66   : > { %s617_s22 = smov %s464_s24  ;;  %21 = sbr.rel (!%p19_p7) target bundleno = 17 (0x11), region = 69 }
  0x6d   :  { %183 = vsyncpa [#allocation5], 1 }
  0x6e   :  { %185 = vsyncpa [#allocation5 + $0x1], 1 }
  0x6f   :  { %186 = vsyncpa [#allocation6], 1 }
  0x70   :  { %188 = vsyncpa [#allocation6 + $0x1], 1 }

</bundles_post_ra>
